<compile_context>
chip_gen: v6e
topology: v6e:2x2x1
jax: 0.10.0
libtpu: 0.0.40
codegen_flags: <defaults>
</compile_context>

<pallas_src>
import jax
import jax.numpy as jnp
from jax.experimental import pallas as pl
from jax.experimental.pallas import tpu as pltpu

# ----------------------------- model config (small, DistilBERT-like) ------------
B = 2            # batch
S = 16           # sequence length (multiple of 16 -> bf16-sublane friendly)
H = 128          # hidden size (multiple of 128 -> lane-dense linear outputs)
NH = 2           # attention heads
HD = H // NH     # head dim
FF = 256         # FFN intermediate size
V = 512          # vocab size
N_LAYERS = 2
AGG = "max"      # Splade default


def _vmem_limit_bytes():
    """Per-generation scoped-VMEM budget (v7x: 64 MiB phys, v5e/v6e: 128 MiB)."""
    cap = 64 * 1024 * 1024
    try:
        info = pltpu.get_tpu_info()
        c = getattr(info, "vmem_capacity_bytes", None)
        if c:
            cap = int(c)
    except Exception:
        pass
    # ~3/4 of physical, capped at 96 MiB (v5e/v6e); ~48 MiB on a 64 MiB v7x part.
    return min((cap * 3) // 4, 96 * 1024 * 1024)


VMEM_LIMIT_BYTES = _vmem_limit_bytes()


def _pick_tile(dim, candidates):
    """Largest candidate tile that evenly divides `dim`, else the full extent.

    The full-extent fallback only triggers at toy shapes (MXU-starved but
    correct); at real DistilBERT shapes the 256/512 candidates win.
    """
    for c in candidates:
        if dim >= c and dim % c == 0:
            return c
    return dim


# ----------------------------- tiled linear (+ optional fused GELU) --------------
def _make_linear_kernel(activation):
    def kernel(x_ref, w_ref, b_ref, o_ref):
        k = pl.program_id(2)

        @pl.when(k == 0)
        def _init():
            # o_ref's block index ignores k -> resident f32 accumulator.
            o_ref[...] = jnp.zeros_like(o_ref)

        o_ref[...] += jnp.dot(x_ref[...], w_ref[...],
                              preferred_element_type=jnp.float32)

        @pl.when(k == pl.num_programs(2) - 1)
        def _finalize():
            y = o_ref[...] + b_ref[...]            # bias in f32
            if activation == "gelu":
                y = jax.nn.gelu(y)                 # fused epilogue, f32
            o_ref[...] = y

    return kernel


def pallas_linear(x, w, b, activation=None):
    """y = act(x @ w + b).  x: [M,K] (cast to bf16), w: [K,N] bf16, b: [N] f32 -> [M,N] f32."""
    x = x.astype(jnp.bfloat16)                     # bf16 activations in HBM
    M, K = x.shape
    Kw, N = w.shape
    assert Kw == K
    tm = _pick_tile(M, (512, 256, 128))
    tn = _pick_tile(N, (1024, 512, 256, 128))
    tk = _pick_tile(K, (1024, 512, 256, 128))
    b2 = b.reshape(1, N)
    grid = (M // tm, N // tn, K // tk)

    flops = 2 * M * N * K
    transcendentals = M * N if activation == "gelu" else 0
    # account for tile re-reads: x re-read N/tn times, w re-read M/tm times.
    bytes_accessed = (x.size * 2 * (N // tn) + w.size * 2 * (M // tm)
                      + N * 4 * (M // tm) + M * N * 4)

    return pl.pallas_call(
        _make_linear_kernel(activation),
        out_shape=jax.ShapeDtypeStruct((M, N), jnp.float32),
        grid_spec=pltpu.PrefetchScalarGridSpec(
            num_scalar_prefetch=0,
            grid=grid,
            in_specs=[
                pl.BlockSpec((tm, tk), lambda i, j, k: (i, k)),
                pl.BlockSpec((tk, tn), lambda i, j, k: (k, j)),
                pl.BlockSpec((1, tn), lambda i, j, k: (0, j)),
            ],
            out_specs=pl.BlockSpec((tm, tn), lambda i, j, k: (i, j)),
        ),
        compiler_params=pltpu.CompilerParams(
            dimension_semantics=("parallel", "parallel", "arbitrary"),
            vmem_limit_bytes=VMEM_LIMIT_BYTES),
        cost_estimate=pl.CostEstimate(flops=flops,
                                      transcendentals=transcendentals,
                                      bytes_accessed=bytes_accessed),
    )(x, w, b2)


# ----------------------------- fused SPLADE head ---------------------------------
def _make_splade_head_kernel(agg, ts):
    def kernel(lens_ref, h_ref, w_ref, b_ref, m_ref, o_ref, acc_ref):
        bi = pl.program_id(1)
        s = pl.program_id(2)

        @pl.when(s == 0)
        def _init():
            # relu(.)*mask >= 0 and log1p(relu(.))*mask >= 0, so 0 is the
            # identity for both the max and the sum accumulators.
            acc_ref[...] = jnp.zeros_like(acc_ref)

        # Skip seq tiles that are entirely padding (lens = last active pos + 1).
        @pl.when(s * ts < lens_ref[bi])
        def _compute():
            logits = jnp.dot(h_ref[0], w_ref[...],
                             preferred_element_type=jnp.float32) + b_ref[...]
            masked = jnp.maximum(logits, 0.0) * m_ref[0]       # (ts, tv), >= 0
            if agg == "sum":
                acc_ref[...] += jnp.log1p(masked)
            else:
                # log1p hoisted to finalize: monotone + binary mask =>
                # max_s log1p(relu*mask) == log1p(max_s relu*mask).
                acc_ref[...] = jnp.maximum(acc_ref[...], masked)

        @pl.when(s == pl.num_programs(2) - 1)
        def _finalize():
            if agg == "sum":
                o_ref[0] = jnp.sum(acc_ref[...], axis=0, keepdims=True)
            else:
                o_ref[0] = jnp.log1p(
                    jnp.max(acc_ref[...], axis=0, keepdims=True))

    return kernel


def _head_tiles(Vv, Ss, Hh, vmem_limit):
    """Pick (tv, ts) from the VMEM budget; prefer 256-multiples for the MXU."""
    ts = _pick_tile(Ss, (256, 128, 64, 32, 16, 8))
    tv = Vv
    for c in (8192, 4096, 2048, 1024, 512, 256, 128):
        if Vv % c:
            continue
        est = (2 * Hh * c * 2        # W tile, bf16, double-buffered
               + ts * c * 4          # (ts, tv) f32 accumulator scratch
               + ts * c * 4          # live f32 logits tile
               + 2 * 1 * c * 4       # bias
               + 2 * ts * Hh * 2     # h tiles, bf16
               + 2 * c * 4)          # output block
        if est <= int(vmem_limit * 0.6):
            tv = c
            break
    if Vv % tv:
        tv = Vv
    return tv, ts


def pallas_splade_head(h, w, b, attention_mask, agg):
    """Fused vocab projection + SPLADE aggregation.

    h: [B,S,H] (cast to bf16), w: [H,V] bf16, b: [V] f32, mask: [B,S] -> [B,V] f32.
    Grid = (vocab tiles, batch, seq tiles): vocab outermost so the projector
    weight tile stays VMEM-resident across (batch, seq) and streams from HBM
    once; seq is the 'arbitrary' reduction axis with a (ts, tv) running
    accumulator collapsed over sublanes only at finalize.
    """
    h = h.astype(jnp.bfloat16)
    Bb, Ss, Hh = h.shape
    Vv = w.shape[1]
    tv, ts = _head_tiles(Vv, Ss, Hh, VMEM_LIMIT_BYTES)

    mask_f = attention_mask.astype(jnp.float32).reshape(Bb, Ss, 1)
    # Exact per-row skip bound for arbitrary binary masks: last active pos + 1.
    pos = jnp.arange(Ss, dtype=jnp.int32)
    lens = jnp.max(jnp.where(attention_mask > 0, pos + 1, 0),
                   axis=1).astype(jnp.int32)
    b2 = b.reshape(1, Vv)
    grid = (Vv // tv, Bb, Ss // ts)

    flops = 2 * Bb * Ss * Hh * Vv
    transcendentals = Bb * Vv if agg == "max" else Bb * Ss * Vv
    bytes_accessed = (h.size * 2 * (Vv // tv) + w.size * 2 + b2.size * 4
                      + mask_f.size * 4 * (Vv // tv) + Bb * Vv * 4)

    out = pl.pallas_call(
        _make_splade_head_kernel(agg, ts),
        out_shape=jax.ShapeDtypeStruct((Bb, 1, Vv), jnp.float32),
        grid_spec=pltpu.PrefetchScalarGridSpec(
            num_scalar_prefetch=1,
            grid=grid,
            in_specs=[
                pl.BlockSpec((1, ts, Hh), lambda j, bi, s, lens: (bi, s, 0)),
                pl.BlockSpec((Hh, tv), lambda j, bi, s, lens: (0, j)),
                pl.BlockSpec((1, tv), lambda j, bi, s, lens: (0, j)),
                pl.BlockSpec((1, ts, 1), lambda j, bi, s, lens: (bi, s, 0)),
            ],
            out_specs=pl.BlockSpec((1, 1, tv), lambda j, bi, s, lens: (bi, 0, j)),
            scratch_shapes=[pltpu.VMEM((ts, tv), jnp.float32)],
        ),
        compiler_params=pltpu.CompilerParams(
            dimension_semantics=("parallel", "parallel", "arbitrary"),
            vmem_limit_bytes=VMEM_LIMIT_BYTES),
        cost_estimate=pl.CostEstimate(flops=flops,
                                      transcendentals=transcendentals,
                                      bytes_accessed=bytes_accessed),
    )(lens, h, w, b2, mask_f)
    return out.reshape(Bb, Vv)


# ----------------------------- plain-JAX glue (tiny at these shapes) --------------
def layer_norm(x, g, b, eps=1e-12):
    mu = jnp.mean(x, axis=-1, keepdims=True)
    var = jnp.mean((x - mu) ** 2, axis=-1, keepdims=True)
    return (x - mu) / jnp.sqrt(var + eps) * g + b


def linear_ref(x, w, b, activation=None):
    y = jnp.dot(x.astype(jnp.bfloat16), w,
                preferred_element_type=jnp.float32) + b.reshape(1, -1)
    if activation == "gelu":
        y = jax.nn.gelu(y)
    return y


def splade_head_ref(h, w, b, attention_mask, agg):
    logits = jnp.einsum("bsh,hv->bsv", h.astype(jnp.bfloat16), w,
                        preferred_element_type=jnp.float32) + b
    act = jnp.log1p(jnp.maximum(logits, 0.0)) * attention_mask.astype(
        jnp.float32)[:, :, None]
    return act.sum(axis=1) if agg == "sum" else act.max(axis=1)


def transformer_layer(x, mask_f, p, lin):
    # x: [B, S, H]
    xf = x.reshape(B * S, H)
    # fused Q/K/V projection: one [H, 3H] matmul instead of three [H, H] ones.
    qkv = lin(xf, p["wqkv"], p["bqkv"]).reshape(B, S, 3, NH, HD)
    q = qkv[:, :, 0].transpose(0, 2, 1, 3)   # (B, NH, S, HD)
    k = qkv[:, :, 1].transpose(0, 2, 1, 3)
    v = qkv[:, :, 2].transpose(0, 2, 1, 3)
    # attention score / softmax / context are tiny here -> plain JAX glue.
    scores = jnp.einsum("bhqd,bhkd->bhqk", q, k) / jnp.sqrt(jnp.float32(HD))
    scores = jnp.where(mask_f[:, None, None, :] > 0.0, scores, -1e9)
    attn = jax.nn.softmax(scores, axis=-1)
    ctx = jnp.einsum("bhqk,bhkd->bhqd", attn, v)
    ctx = ctx.transpose(0, 2, 1, 3).reshape(B * S, H)
    sa = lin(ctx, p["wo"], p["bo"]).reshape(B, S, H)
    x = layer_norm(x + sa, p["ln1_g"], p["ln1_b"])
    ff = lin(x.reshape(B * S, H), p["w1"], p["b1"], activation="gelu")  # bias+GELU fused
    ff = lin(ff, p["w2"], p["b2"]).reshape(B, S, H)
    x = layer_norm(x + ff, p["ln2_g"], p["ln2_b"])
    return x


def splade_forward(params, input_ids, attention_mask, agg=AGG, use_pallas=True):
    lin = pallas_linear if use_pallas else linear_ref
    mask_f = attention_mask.astype(jnp.float32)

    # embeddings
    x = jnp.take(params["word_emb"], input_ids, axis=0) + params["pos_emb"][None, :S, :]
    x = layer_norm(x, params["emb_ln_g"], params["emb_ln_b"])

    for p in params["layers"]:
        x = transformer_layer(x, mask_f, p, lin)

    # MLM head: vocab_transform(+GELU fused) -> vocab_layer_norm -> vocab_projector
    hp = params["head"]
    h = lin(x.reshape(B * S, H), hp["w_t"], hp["b_t"], activation="gelu").reshape(B, S, H)
    h = layer_norm(h, hp["ln_g"], hp["ln_b"])

    if use_pallas:
        return pallas_splade_head(h, hp["w_proj"], hp["b_proj"], attention_mask, agg)
    return splade_head_ref(h, hp["w_proj"], hp["b_proj"], attention_mask, agg)


# ----------------------------- deterministic params ------------------------------
def init_params(key):
    keys = iter(jax.random.split(key, 128))

    def nrm(shape, dtype=jnp.float32):
        return (0.02 * jax.random.normal(next(keys), shape)).astype(dtype)

    def zeros(n):
        return jnp.zeros((n,), jnp.float32)

    def ones(n):
        return jnp.ones((n,), jnp.float32)

    bf16 = jnp.bfloat16  # matmul weights stored bf16 (halves HBM/VMEM traffic)
    params = {
        "word_emb": nrm((V, H)),
        "pos_emb": nrm((S, H)),
        "emb_ln_g": ones(H),
        "emb_ln_b": zeros(H),
        "layers": [],
        "head": {
            "w_t": nrm((H, H), bf16), "b_t": zeros(H),
            "ln_g": ones(H), "ln_b": zeros(H),
            "w_proj": nrm((H, V), bf16), "b_proj": zeros(V),
        },
    }
    for _ in range(N_LAYERS):
        params["layers"].append({
            "wqkv": nrm((H, 3 * H), bf16), "bqkv": zeros(3 * H),
            "wo": nrm((H, H), bf16), "bo": zeros(H),
            "ln1_g": ones(H), "ln1_b": zeros(H),
            "w1": nrm((H, FF), bf16), "b1": zeros(FF),
            "w2": nrm((FF, H), bf16), "b2": zeros(H),
            "ln2_g": ones(H), "ln2_b": zeros(H),
        })
    return params


# ----------------------------- main ----------------------------------------------
if __name__ == "__main__":
    key = jax.random.PRNGKey(0)
    k_param, k_ids = jax.random.split(key)

    params = init_params(k_param)
    input_ids = jax.random.randint(k_ids, (B, S), 0, V, dtype=jnp.int32)
    # row 0: fully active; row 1: 10 real tokens + 6 padding (binary prefix mask).
    pos = jnp.arange(S, dtype=jnp.int32)
    attention_mask = jnp.stack([
        jnp.ones((S,), jnp.int32),
        (pos < 10).astype(jnp.int32),
    ], axis=0)

    for agg in ("max", "sum"):
        lexical_reps = jax.block_until_ready(
            splade_forward(params, input_ids, attention_mask,
                           agg=agg, use_pallas=True))
        ref = jax.block_until_ready(
            splade_forward(params, input_ids, attention_mask,
                           agg=agg, use_pallas=False))
        assert lexical_reps.shape == (B, V)
        assert jnp.allclose(lexical_reps, ref, atol=1e-3, rtol=1e-3), (
            agg, float(jnp.max(jnp.abs(lexical_reps - ref))))

    print("KERNEL_OK")
</pallas_src>

<mosaic_0001>
module attributes {stable_mosaic.version = 11 : i64} {
  func.func @kernel(%arg0: i32, %arg1: i32, %arg2: i32, %arg3: memref<32x128xbf16, #tpu.memory_space<vmem>>, %arg4: memref<128x128xbf16, #tpu.memory_space<vmem>>, %arg5: memref<1x128xf32, #tpu.memory_space<vmem>>, %arg6: memref<32x128xf32, #tpu.memory_space<vmem>>) attributes {dimension_semantics = [#tpu.dimension_semantics<parallel>, #tpu.dimension_semantics<parallel>, #tpu.dimension_semantics<arbitrary>], iteration_bounds = array<i64: 1, 3, 1>, scalar_prefetch = 0 : i64, scratch_operands = 0 : i64, tpu.core_type = #tpu.core_type<tc>, window_params = [{transform_indices = @transform_0, window_bounds = array<i64: 32, 128>}, {transform_indices = @transform_1, window_bounds = array<i64: 128, 128>}, {transform_indices = @transform_2, window_bounds = array<i64: 1, 128>}, {transform_indices = @transform_3, window_bounds = array<i64: 32, 128>}]} {
    %c0_i32 = arith.constant 0 : i32
    %0 = arith.cmpi eq, %arg2, %c0_i32 : i32
    %1 = arith.extui %0 : i1 to i32
    %c0_i32_0 = arith.constant 0 : i32
    %2 = arith.cmpi ne, %1, %c0_i32_0 : i32
    scf.if %2 {
      %cst_10 = arith.constant 0.000000e+00 : f32
      %12 = vector.broadcast %cst_10 : f32 to vector<32x128xf32>
      %c0_11 = arith.constant 0 : index
      %c0_12 = arith.constant 0 : index
      %13 = vector.load %arg6[%c0_11, %c0_12] : memref<32x128xf32, #tpu.memory_space<vmem>>, vector<32x128xf32>
      tpu.vector_store %arg6[%c0_11, %c0_12], %12 {strides = array<i32>} : memref<32x128xf32, #tpu.memory_space<vmem>>, vector<32x128xf32>,
    } else {
    }
    %c0 = arith.constant 0 : index
    %c0_1 = arith.constant 0 : index
    %3 = vector.load %arg6[%c0, %c0_1] : memref<32x128xf32, #tpu.memory_space<vmem>>, vector<32x128xf32>
    %c0_2 = arith.constant 0 : index
    %c0_3 = arith.constant 0 : index
    %4 = vector.load %arg3[%c0_2, %c0_3] : memref<32x128xbf16, #tpu.memory_space<vmem>>, vector<32x128xbf16>
    %c0_4 = arith.constant 0 : index
    %c0_5 = arith.constant 0 : index
    %5 = vector.load %arg4[%c0_4, %c0_5] : memref<128x128xbf16, #tpu.memory_space<vmem>>, vector<128x128xbf16>
    %cst = arith.constant dense<0.000000e+00> : vector<32x128xf32>
    %6 = tpu.matmul %4, %5, %cst {dimension_numbers = #tpu.dot_dimension_numbers<[1], [0], [0], [1], [0, 0, 1, 1], [], []>} : vector<32x128xbf16>, vector<128x128xbf16>, vector<32x128xf32> -> vector<32x128xf32>
    %7 = arith.addf %3, %6 : vector<32x128xf32>
    %c0_6 = arith.constant 0 : index
    %c0_7 = arith.constant 0 : index
    %8 = vector.load %arg6[%c0_6, %c0_7] : memref<32x128xf32, #tpu.memory_space<vmem>>, vector<32x128xf32>
    tpu.vector_store %arg6[%c0_6, %c0_7], %7 {strides = array<i32>} : memref<32x128xf32, #tpu.memory_space<vmem>>, vector<32x128xf32>,
    %c0_i32_8 = arith.constant 0 : i32
    %9 = arith.cmpi eq, %arg2, %c0_i32_8 : i32
    %10 = arith.extui %9 : i1 to i32
    %c0_i32_9 = arith.constant 0 : i32
    %11 = arith.cmpi ne, %10, %c0_i32_9 : i32
    scf.if %11 {
      %c0_10 = arith.constant 0 : index
      %c0_11 = arith.constant 0 : index
      %12 = vector.load %arg6[%c0_10, %c0_11] : memref<32x128xf32, #tpu.memory_space<vmem>>, vector<32x128xf32>
      %c0_12 = arith.constant 0 : index
      %c0_13 = arith.constant 0 : index
      %13 = vector.load %arg5[%c0_12, %c0_13] : memref<1x128xf32, #tpu.memory_space<vmem>>, vector<1x128xf32>
      %14 = vector.broadcast %13 : vector<1x128xf32> to vector<32x128xf32>
      %15 = arith.addf %12, %14 : vector<32x128xf32>
      %c0_14 = arith.constant 0 : index
      %c0_15 = arith.constant 0 : index
      %16 = vector.load %arg6[%c0_14, %c0_15] : memref<32x128xf32, #tpu.memory_space<vmem>>, vector<32x128xf32>
      tpu.vector_store %arg6[%c0_14, %c0_15], %15 {strides = array<i32>} : memref<32x128xf32, #tpu.memory_space<vmem>>, vector<32x128xf32>,
    } else {
    }
    return
  }
  func.func @transform_0(%arg0: i32, %arg1: i32, %arg2: i32) -> (i32, i32) {
    %c0_i32 = arith.constant 0 : i32
    return %arg0, %arg2 : i32, i32
  }
  func.func @transform_1(%arg0: i32, %arg1: i32, %arg2: i32) -> (i32, i32) {
    %c0_i32 = arith.constant 0 : i32
    return %arg2, %arg1 : i32, i32
  }
  func.func @transform_2(%arg0: i32, %arg1: i32, %arg2: i32) -> (i32, i32) {
    %c0_i32 = arith.constant 0 : i32
    %c0_i32_0 = arith.constant 0 : i32
    return %c0_i32, %arg1 : i32, i32
  }
  func.func @transform_3(%arg0: i32, %arg1: i32, %arg2: i32) -> (i32, i32) {
    %c0_i32 = arith.constant 0 : i32
    return %arg0, %arg1 : i32, i32
  }
}

</mosaic_0001>

<bundles_post_ra>
// kernel: tpu_custom_call.1
= control target key start
LH: loop header
LB: loop body
LE: loop exit
PB: predicated region body
PF: predicated region fallthrough
CT: control target
= control target key end

     0   :  { %8 = vsyncpa [#allocation3], 0  ;;  %s1057_s0 = inlined_call_operand.hbm [shape: bf16[32,128], index: 0, kind: input, shape index: {}]   ;;  %s1058_s1 = inlined_call_operand.hbm [shape: bf16[128,384], index: 1, kind: input, shape index: {}]   ;;  %s1059_s2 = inlined_call_operand.vmem [shape: f32[1,384], index: 2, kind: input, shape index: {}]   ;;  %s1060_s3 = inlined_call_operand.hbm [shape: f32[32,384], index: 3, kind: output, shape index: {}]  }
   0x1   :  { %9 = vsyncpa [#allocation6], 0 }
   0x2   :  { %11 = vsyncpa [#allocation6 + $0x1], 0 }
   0x3   :  { %12 = vsyncpa [#allocation4], 0 }
   0x4   :  { %14 = vsyncpa [#allocation4 + $0x1], 0  ;;  %s873_s12 = smov 0   ;;  %s875_s13 = smov 0  }
   0x5   :  { %s877_s14 = smov 0   ;;  %s879_s15 = smov 0  }
   0x6   :  { %s881_s16 = smov 0   ;;  %s883_s17 = smov 0  }
   0x7 LB: > { %1066 = sst [smem:[#allocation11_spill]] %s822_s12  ;;  %s558_s18 = sadd.s32 4294967295, %s842_s17   ;;  %s842_s17 = sphi %s883_s17, %s20_s17   ;;  %s838_s16 = sphi %s881_s16, %s1087_s16   ;;  %s834_s15 = sphi %s879_s15, %s1086_s15   ;;  %s830_s14 = sphi %s877_s14, %s1085_s14   ;;  %s826_s13 = sphi %s875_s13, %s1084_s13   ;;  %s822_s12 = sphi %s873_s12, %s1083_s12  }
   0x8   : > { %s559_s19 = sadd.s32 4294967294, %s842_s17   ;;  %p83_p0 = scmp.ne.s32.totalorder %s830_s14, %s826_s13 }
   0x9   : > { %p84_p1 = scmp.eq.s32.totalorder %s842_s17, 0  ;;  %p89_p2 = scmp.ne.s32.totalorder %s826_s13, %s822_s12 }
   0xa   : > { %p910_p3 = scmp.eq.s32.totalorder %s558_s18, 0  ;;  %p141_p5 = scmp.eq.s32.totalorder %s558_s18, 2 }
   0xb   : > { %p914_p4 = por %p84_p1, %p83_p0  ;;  %p147_p7 = scmp.eq.s32.totalorder %s559_s19, 2 }
   0xc   : > { %p920_p6 = por %p910_p3, %p89_p2  ;;  %p924_p8 = por %p141_p5, %p83_p0 }
   0xd   : > { %p560_p9 = scmp.ge.s32.totalorder %s842_s17, 1  ;;  %p929_p10 = por %p147_p7, %p89_p2 }
   0xe   : > { %s1069_s22 = scalar_select %p920_p6, 1, 0 }
   0xf   : > { %s1070_s23 = scalar_select %p924_p8, 1, 0 }
  0x10   : > { %s1071_s24 = scalar_select %p929_p10, 1, 0 }
  0x11   : > { %p154_p11 = scmp.lt.s32.totalorder %s842_s17, 4  ;;  %s844_s26 = smov [#allocation2]  }
  0x12   : > { %1072 = sst [smem:[#allocation12_spill]] %s1071_s24  ;;  %s170_s27 = sshll.u32 %s844_s26, 4  ;;  %s171_s27 = int_to_ptr.vmem [resolvable:$true] %s170_s27 }
  0x13   : > { %p934_p12 = pnand %p560_p9, %p154_p11  ;;  %p635_p0 = scmp.lt.s32.totalorder %s842_s17, 3 }
  0x14   : > { %s35_s30 = sadd.s32 1, %s838_s16  ;;  %s715_s4 = scalar_lea.vmem %s171_s27, 256 }
  0x15   : > { %p622_p13 = pneg %p934_p12  ;;  %p949_p2 = pnand %p635_p0, %p914_p4 }
  0x16   : > { %p716_p7 = scmp.ne.s32.totalorder %s171_s27, %s715_s4  ;;  %p723_p10 = scmp.lt.s32.totalorder %s171_s27, %s171_s27 }
  0x17   : > { %p943_p1 = pnand %p622_p13, %p910_p3  ;;  %p724_p8 = scmp.lt.s32.totalorder %s715_s4, %s715_s4 }
  0x19   : > { %p706_p5 = pneg %p943_p1  ;;  %p725_p6 = por %p724_p8, %p723_p10 }
  0x1b   : > { %p718_p9 = pnand %p716_p7, %p706_p5 }
  0x1d   : > { %p719_p11 = pneg %p718_p9 }
  0x1f   : > { %p726_p13 = pnand %p725_p6, %p719_p11 }
  0x21   : > { %729 = shalt.err (!%p726_p13)
}
  0x22   : > { %s1065_s5 = smov 64   ;;  %s846_s6 = smov 4  }
  0x23   : > { %625 = dma.hbm_to_vmem [thread:$0]  (!%p943_p1), %s1057_s0, 256, %s171_s27, [#allocation3], %s1065_s5, %s1065_s5, %s846_s6  }
  0x24   : > { %p37_p4 = scmp.ge.s32.totalorder %s35_s30, 3  ;;  %s76_s9 = sadd.s32 1, %s830_s14 }
  0x25   : > { %s184_s10 = sand.u32 1, %s830_s14   ;;  %s564_s19 = sshll.u32 %s838_s16, 6 }
  0x26   : > { %s1089_s30 = smov (%p37_p4, %s35_s30), 0  ;;  %s563_s11 = sshll.u32 %s184_s10, 6 }
  0x27   : > { %s72_s18 = ssub.s32 %s838_s16, %s1089_s30  ;;  %s196_s28 = scalar_lea.hbm %s1058_s1, %s564_s19 }
  0x28   : > { %p74_p6 = scmp.eq.s32.totalorder %s72_s18, 0  ;;  %s188_s4 = scalar_lea.vmem [#allocation5], %s563_s11 }
  0x29   : > { %s197_s24 = sshll.u32 %s188_s4, 4  ;;  %s185_s27 = scalar_lea.sflag [#allocation6], %s184_s10  ;;  %s198_s24 = int_to_ptr.vmem [resolvable:$true] %s197_s24 }
  0x2a   : > { %s975_s12 = scalar_select %p74_p6, %s830_s14, %s76_s9  }
  0x2b   : > { %p732_p8 = pneg %p949_p2  ;;  %s743_s7 = scalar_lea.vmem %s198_s24, 1024 }
  0x2c   : > { %p744_p10 = scmp.ne.s32.totalorder %s198_s24, %s743_s7  ;;  %s847_s8 = smov [#allocation5]  }
  0x2d   : > { %s748_s5 = sshll.u32 %s847_s8, 4  ;;  %s749_s5 = int_to_ptr.vmem [resolvable:$false] %s748_s5 }
  0x2e   : > { %p746_p0 = pnand %p744_p10, %p732_p8  ;;  %s750_s18 = scalar_lea.vmem %s749_s5, 2048 }
  0x2f   : > { %p751_p5 = scmp.lt.s32.totalorder %s198_s24, %s749_s5  ;;  %p752_p7 = scmp.lt.s32.totalorder %s750_s18, %s743_s7 }
  0x30   : > { %p747_p1 = pneg %p746_p0 }
  0x31   : > { %p753_p9 = por %p752_p7, %p751_p5 }
  0x33   : > { %p754_p11 = pnand %p753_p9, %p747_p1 }
  0x35   : > { %757 = shalt.err (!%p754_p11)
}
  0x36   : > { %s848_s11 = smov 192   ;;  %s1076_s9 = smov 64  }
  0x37   : > { %629 = dma.hbm_to_vmem [thread:$0]  (!%p949_p2), %s196_s28, 1024, %s198_s24, %s185_s27, %s848_s11, %s1076_s9, %s846_s6  }
  0x38   : > { %215 = sbr.rel (%p934_p12) target bundleno = 315 (0x13b), region = 32 }
  0x3d   : > { %809 = dma.done.wait (%p910_p3), [#allocation3], 256  }
  0x3e   : > { %811 = vsyncadd (%p910_p3), [#allocation3], 4294967040  ;;  %s990_s5 = sand.u32 1, %s826_s13   ;;  %p1077_p13 = scmp.ne.s32.totalorder %s1069_s22, 0 }
  0x3f   : > { %s567_s10 = sshll.u32 %s990_s5, 6  ;;  %s222_s29 = scalar_lea.sflag [#allocation6], %s990_s5 }
  0x40   : > { %s225_s19 = scalar_lea.vmem [#allocation5], %s567_s10 }
  0x41   : > { %813 = dma.done.wait (%p1077_p13), %s222_s29, 1024  }
  0x42   : > { %815 = vsyncadd (%p1077_p13), %s222_s29, 4294966272  ;;  %v694_v0 = vld [vmem:[%s225_s19 + $0x38] sm:$0xff]   ;;  %v695_v1 = vld [vmem:[%s225_s19 + $0x30] sm:$0xff]   ;;  %p253_p3 = scmp.lt.s32.totalorder %s834_s15, 2  ;;  %s568_s6 = sshll.u32 %s990_s5, 5 }
  0x43   : > { %594 = vmatprep.subr.bf16.mxu0 %v694_v0  ;;  %v696_v2 = vld [vmem:[%s225_s19 + $0x28] sm:$0xff]   ;;  %v697_v3 = vld [vmem:[%s225_s19 + $0x20] sm:$0xff]   ;;  %v702_v4 = vld [vmem:[#allocation2] sm:$0xff]   ;;  %s581_s21 = sshll.u32 %s834_s15, 7  ;;  %s250_s26 = scalar_lea.vmem [#allocation7], %s568_s6 }
  0x44   : > { %595 = vmatpush3.bf16.msra.mxu0 %v694_v0  ;;  %610 = vmatprep.mubr.bf16.mxu0 %v702_v4  ;;  %v698_v5 = vld [vmem:[%s225_s19 + $0x18] sm:$0xff]   ;;  %v699_v6 = vld [vmem:[%s225_s19 + $0x10] sm:$0xff]   ;;  %v700_v7 = vld [vmem:[%s225_s19 + $0x8] sm:$0xff]   ;;  %s254_s20 = scalar_select %p253_p3, %s834_s15, 2 }
  0x45   : > { %596 = vmatprep.subr.bf16.mxu0 %v695_v1  ;;  %v701_v8 = vld [vmem:[%s225_s19] sm:$0xff]   ;;  %v703_v9 = vld [vmem:[#allocation2 + $0x8] sm:$0xff]   ;;  %s445_s28 = sshll.u32 %s250_s26, 4  ;;  %s1008_s7 = scalar_lea.hbm %s1060_s3, %s581_s21  ;;  %s1010_s28 = int_to_ptr.vmem [resolvable:$true] %s445_s28 }
  0x46   : > { %s255_s25 = scalar_lea.vmem %s1059_s2, %s254_s20  ;;  %s430_s15 = scalar_lea.sflag [#allocation4], %s990_s5 }
  0x47   : > { %v579_v11 = vld [vmem:[%s255_s25] ss:$0 sm:$0xff]  ;;  %s758_s8 = scalar_lea.vmem %s1010_s28, 512  ;;  %p1078_p2 = scmp.ne.s32.totalorder %s1070_s23, 0 }
  0x48   : > { %597 = vmatpush3.bf16.msra.mxu0 %v695_v1  ;;  %p759_p12 = scmp.ne.s32.totalorder %s1010_s28, %s758_s8  ;;  %s849_s18 = smov [#allocation7]  }
  0x49   : > { %598 = vmatprep.subr.bf16.mxu0 %v696_v2  ;;  %s762_s11 = sshll.u32 %s849_s18, 4  ;;  %s763_s11 = int_to_ptr.vmem [resolvable:$false] %s762_s11 }
  0x4a   : > { %p760_p4 = pnand %p759_p12, %p1078_p2  ;;  %s764_s9 = scalar_lea.vmem %s763_s11, 1024 }
  0x4b   : > { %p765_p8 = scmp.lt.s32.totalorder %s1010_s28, %s763_s11  ;;  %p766_p10 = scmp.lt.s32.totalorder %s764_s9, %s758_s8 }
  0x4c   : > { %599 = vmatpush3.bf16.msra.mxu0 %v696_v2  ;;  %p761_p6 = pneg %p760_p4 }
  0x4d   : > { %600 = vmatprep.subr.bf16.mxu0 %v697_v3  ;;  %p767_p0 = por %p766_p10, %p765_p8 }
  0x4f   : > { %p768_p1 = pnand %p767_p0, %p761_p6 }
  0x50   : > { %601 = vmatpush3.bf16.msra.mxu0 %v697_v3 }
  0x51   : > { %602 = vmatprep.subr.bf16.mxu0 %v698_v5 }
  0x54   : > { %603 = vmatpush3.bf16.msra.mxu0 %v698_v5 }
  0x55   : > { %604 = vmatprep.subr.bf16.mxu0 %v699_v6 }
  0x58   : > { %605 = vmatpush3.bf16.msra.mxu0 %v699_v6 }
  0x59   : > { %606 = vmatprep.subr.bf16.mxu0 %v700_v7 }
  0x5c   : > { %607 = vmatpush3.bf16.msra.mxu0 %v700_v7 }
  0x5d   : > { %608 = vmatprep.subr.bf16.mxu0 %v701_v8 }
  0x60   : > { %609 = vmatpush3.bf16.msra.mxu0 %v701_v8 }
  0x63   : > { %611 = vmatmul.mubr.bf16.vlgmr.msra.gmra.mxu0 %v703_v9 }
 0x123   : > { %v612_v10 = vpop.f32.mrf.mxu0 }
 0x124   : > { %v423_v13 = vadd.f32 %v612_v10, %v579_v11 }
 0x125   : > { %v384_v12 = vpop.f32.mrf.mxu0 }
 0x126   : > { %427 = vst [vmem:[%s250_s26 + $0x10] sm:$0xff] %v423_v13  ;;  %v421_v15 = vadd.f32 %v579_v11, %v384_v12 }
 0x127   : > { %v613_v14 = vpop.f32.mrf.mxu0 }
 0x128   : > { %425 = vst [vmem:[%s250_s26] sm:$0xff] %v421_v15  ;;  %v424_v17 = vadd.f32 %v613_v14, %v579_v11 }
 0x129   : > { %v387_v16 = vpop.f32.mrf.mxu0 }
 0x12a   : > { %428 = vst [vmem:[%s250_s26 + $0x18] sm:$0xff] %v424_v17  ;;  %v422_v18 = vadd.f32 %v579_v11, %v387_v16 }
 0x12c   : > { %426 = vst [vmem:[%s250_s26 + $0x8] sm:$0xff] %v422_v18 }
 0x12d   : > { %771 = shalt.err (!%p768_p1)
}
 0x12e   : > { %s772_s10 = scalar_lea.hbm %s1008_s7, 512  ;;  %s776_s20 = scalar_lea.hbm %s1060_s3, 1536 }
 0x12f   : > { %p773_p5 = scmp.ne.s32.totalorder %s1008_s7, %s772_s10  ;;  %p777_p11 = scmp.lt.s32.totalorder %s1008_s7, %s1060_s3 }
 0x130   : > { %p778_p13 = scmp.lt.s32.totalorder %s776_s20, %s772_s10 }
 0x131   : > { %p774_p7 = pnand %p773_p5, %p1078_p2 }
 0x132   : > { %p779_p3 = por %p778_p13, %p777_p11 }
 0x133   : > { %p775_p9 = pneg %p774_p7 }
 0x135   : > { %p780_p12 = pnand %p779_p3, %p775_p9 }
 0x137   : > { %783 = shalt.err (!%p780_p12)
}
 0x138   : > { %s850_s25 = smov 128   ;;  %s851_s6 = smov 384  }
 0x139   : > { %s852_s21 = smov 8  }
 0x13a   : > { %620 = dma.vmem_to_hbm [thread:$0]  (%p1078_p2), %s1010_s28, 512, %s1008_s7, %s430_s15, %s850_s25, %s851_s6, %s852_s21  }
 0x13b PF: > { %s1079_s26 = sld [smem:[#allocation11_spill]]  ;;  %p637_p4 = scmp.ge.s32.totalorder %s842_s17, 2 }
 0x13c   : > { %s1080_s4 = sld [smem:[#allocation12_spill]] }
 0x141   : > { %s460_s27 = sand.u32 1, %s1079_s26  }
 0x142   : > { %p1081_p6 = scmp.ne.s32.totalorder %s1080_s4, 0  ;;  %s461_s8 = scalar_lea.sflag [#allocation4], %s460_s27 }
 0x144   : > { %p631_p8 = pnand %p637_p4, %p1081_p6 }
 0x146   : > { %p632_p10 = pneg %p631_p8 }
 0x148   : > { %817 = dma.done.wait (%p632_p10), %s461_s8, 512  }
 0x149   : > { %819 = vsyncadd (%p632_p10), %s461_s8, 4294966784  ;;  %s20_s17 = sadd.s32 1, %s842_s17   ;;  %s1082_s23 = smov %s975_s12 }
 0x14a   : > { %p17_p0 = scmp.ge.s32.totalorder %s20_s17, 5   ;;  %s1083_s12 = smov %s826_s13 }
 0x14b   : > { %s1084_s13 = smov %s830_s14  ;;  %s1085_s14 = smov %s1082_s23 }
 0x14c   : > { %s1086_s15 = smov %s838_s16  ;;  %s1087_s16 = smov %s1089_s30 }
 0x14d   :  { %19 = sbr.rel (!%p17_p0) target bundleno = 7 (0x7), region = 94 }
 0x152   :  { %466 = vsyncpa [#allocation3], 1 }
 0x153   :  { %468 = vsyncpa [#allocation3 + $0x1], 1 }
 0x154   :  { %469 = vsyncpa [#allocation6], 1 }
 0x155   :  { %471 = vsyncpa [#allocation6 + $0x1], 1 }
 0x156   :  { %472 = vsyncpa [#allocation4], 1 }
 0x157   :  { %474 = vsyncpa [#allocation4 + $0x1], 1 }

</bundles_post_ra>
